<compile_context>
chip_gen: v5e
topology: v5e:2x2
jax: 0.10.0
libtpu: 0.0.40
codegen_flags: <defaults>
</compile_context>

<pallas_src>
import functools
import math

import jax
import jax.numpy as jnp
from jax.experimental import pallas as pl
from jax.experimental.pallas import tpu as pltpu


def _pick_tile(L, candidates=(256, 128)):
    for t in candidates:
        if L % t == 0:
            return t
    return L


# ----------------------------------------------------------------------------
# Kernel 1: per-(batch, head, q-tile) projection + top-m attention.
# ----------------------------------------------------------------------------
def attn_kernel(q_ref, k_ref, v_ref, wq_ref, wk_ref, wv_ref, o_ref,
                kh_ref, vh_ref, *, m_value):
    i = pl.program_id(2)

    # Cache this head's K / V projections once per (batch, head); reused by
    # every query tile (q-tile axis is the innermost, "arbitrary" axis).
    @pl.when(i == 0)
    def _():
        kh_ref[...] = jnp.dot(k_ref[0], wk_ref[0],
                              preferred_element_type=jnp.float32)
        vh_ref[...] = jnp.dot(v_ref[0], wv_ref[0],
                              preferred_element_type=jnp.float32)

    # Q projection for this tile only: [TQ, E] @ [E, D] -> [TQ, D]
    qh = jnp.dot(q_ref[0], wq_ref[0], preferred_element_type=jnp.float32)

    # energy = q_h @ k_h^T -> [TQ, Lk]
    kh = kh_ref[...]
    energy = jax.lax.dot_general(qh, kh, (((1,), (1,)), ((), ())),
                                 preferred_element_type=jnp.float32)

    tq, lk = energy.shape
    kidx = jax.lax.broadcasted_iota(jnp.int32, (tq, lk), 1)
    neg_inf = jnp.float32(-jnp.inf)

    # Round 0's max IS the global row max -> reuse it for the softmax later.
    row_max = jnp.max(energy, axis=-1, keepdims=True)

    # top-m selection mask: m rounds of (arg)max with lowest-index tie-break,
    # masking out each chosen position.  Last round skips the `running`
    # update (not needed).
    running = energy
    sel = jnp.zeros((tq, lk), dtype=jnp.float32)
    cur_max = row_max
    for t in range(m_value):
        if t > 0:
            cur_max = jnp.max(running, axis=-1, keepdims=True)
        is_max = running == cur_max
        chosen_idx = jnp.min(jnp.where(is_max, kidx, lk),
                             axis=-1, keepdims=True)
        chosen = kidx == chosen_idx
        sel = jnp.where(chosen, jnp.float32(1.0), sel)
        if t + 1 < m_value:
            running = jnp.where(chosen, neg_inf, running)

    # Masked softmax over the selected (top-m) energies only; non-selected
    # positions get weight 0, so attn @ V == weighted sum of the gathered
    # top-m values (exactly the torch gather/einsum result).
    p = jnp.exp(energy - row_max) * sel
    denom = jnp.sum(p, axis=-1, keepdims=True)
    attn = p * pl.reciprocal(denom, approx=False)  # approx=True is the perf knob

    out = jnp.dot(attn, vh_ref[...], preferred_element_type=jnp.float32)
    o_ref[0, 0] = out.astype(o_ref.dtype)


# ----------------------------------------------------------------------------
# Kernel 2: fc_out (matmul + bias).
# ----------------------------------------------------------------------------
def fc_kernel(x_ref, w_ref, b_ref, o_ref):
    o_ref[0] = (jnp.dot(x_ref[0], w_ref[...],
                        preferred_element_type=jnp.float32)
                + b_ref[...]).astype(o_ref.dtype)


# ----------------------------------------------------------------------------
# Wrapper
# ----------------------------------------------------------------------------
def topm_attention(value, key_, query, wq_t, wk_t, wv_t, wo_t, bo,
                   *, heads, m_value):
    N, Lq, E = query.shape
    Lk = key_.shape[1]
    Lv = value.shape[1]
    assert E % heads == 0
    D = E // heads
    assert Lk == Lv, "top-m gather assumes key_len == value_len"
    assert m_value <= Lk, "m_value must not exceed key_len (torch.topk requirement)"

    TQ = _pick_tile(Lq)
    nQ = Lq // TQ

    # Per-head weight columns [heads, E, D]; wq_h[h] == wq_t[:, h*D:(h+1)*D].
    # Done once on tiny weight tensors in plain JAX (layout plumbing only).
    wq_h = jnp.transpose(wq_t.reshape(E, heads, D), (1, 0, 2))
    wk_h = jnp.transpose(wk_t.reshape(E, heads, D), (1, 0, 2))
    wv_h = jnp.transpose(wv_t.reshape(E, heads, D), (1, 0, 2))

    attn_out = pl.pallas_call(
        functools.partial(attn_kernel, m_value=m_value),
        out_shape=jax.ShapeDtypeStruct((N, heads, Lq, D), jnp.float32),
        grid_spec=pltpu.PrefetchScalarGridSpec(
            num_scalar_prefetch=0,
            grid=(N, heads, nQ),
            in_specs=[
                pl.BlockSpec((1, TQ, E), lambda n, h, i: (n, i, 0)),   # query tile
                pl.BlockSpec((1, Lk, E), lambda n, h, i: (n, 0, 0)),   # key (per batch)
                pl.BlockSpec((1, Lv, E), lambda n, h, i: (n, 0, 0)),   # value (per batch)
                pl.BlockSpec((1, E, D), lambda n, h, i: (h, 0, 0)),    # wq head cols
                pl.BlockSpec((1, E, D), lambda n, h, i: (h, 0, 0)),    # wk head cols
                pl.BlockSpec((1, E, D), lambda n, h, i: (h, 0, 0)),    # wv head cols
            ],
            out_specs=pl.BlockSpec((1, 1, TQ, D),
                                   lambda n, h, i: (n, h, i, 0)),
            scratch_shapes=[
                pltpu.VMEM((Lk, D), jnp.float32),   # cached K projection (this head)
                pltpu.VMEM((Lv, D), jnp.float32),   # cached V projection (this head)
            ],
        ),
        compiler_params=pltpu.CompilerParams(
            dimension_semantics=("parallel", "parallel", "arbitrary"),
            vmem_limit_bytes=48 * 1024 * 1024),
    )(query, key_, value, wq_h, wk_h, wv_h)

    # Reproduce the torch code's reshape EXACTLY: [N, H, Q, D] -> [N, Q, H*D]
    # with NO permute.  Row-major reinterpretation => pure metadata reshape.
    x = attn_out.reshape(N, Lq, heads * D)

    out = pl.pallas_call(
        fc_kernel,
        out_shape=jax.ShapeDtypeStruct((N, Lq, E), jnp.float32),
        grid_spec=pltpu.PrefetchScalarGridSpec(
            num_scalar_prefetch=0,
            grid=(N, nQ),
            in_specs=[
                pl.BlockSpec((1, TQ, heads * D), lambda n, i: (n, i, 0)),
                pl.BlockSpec((heads * D, E), lambda n, i: (0, 0)),
                pl.BlockSpec((1, E), lambda n, i: (0, 0)),
            ],
            out_specs=pl.BlockSpec((1, TQ, E), lambda n, i: (n, i, 0)),
        ),
        compiler_params=pltpu.CompilerParams(
            dimension_semantics=("parallel", "parallel"),
            vmem_limit_bytes=48 * 1024 * 1024),
    )(x, wo_t, bo.reshape(1, E))
    return out


# ----------------------------------------------------------------------------
# Pure-JAX reference (mirrors the PyTorch forward, incl. the direct reshape).
# ----------------------------------------------------------------------------
def topm_attention_ref(value, key_, query, wq_t, wk_t, wv_t, wo_t, bo,
                       *, heads, m_value):
    N, Lq, E = query.shape
    D = E // heads
    v = (value @ wv_t).reshape(N, -1, heads, D)
    k = (key_ @ wk_t).reshape(N, -1, heads, D)
    q = (query @ wq_t).reshape(N, -1, heads, D)
    energy = jnp.einsum('nqhd,nkhd->nhqk', q, k)
    top_vals, top_idx = jax.lax.top_k(energy, m_value)
    attn = jax.nn.softmax(top_vals, axis=-1)
    vperm = jnp.transpose(v, (0, 2, 1, 3))                  # [N,H,K,D]
    K = vperm.shape[2]
    vexp = jnp.broadcast_to(vperm[:, :, None, :, :], (N, heads, Lq, K, D))
    sel = jnp.take_along_axis(vexp, top_idx[..., None], axis=3)  # [N,H,Q,M,D]
    out = jnp.einsum('nhqm,nhqmd->nhqd', attn, sel)
    out = out.reshape(N, Lq, heads * D)                     # same "no-permute" reshape
    return out @ wo_t + bo[None, None, :]


if __name__ == "__main__":
    # Small shapes consistent with the module.
    N, L, E, heads, m_value = 2, 8, 32, 4, 3

    key = jax.random.PRNGKey(0)
    ks = jax.random.split(key, 8)
    scale = 1.0 / math.sqrt(E)
    value = jax.random.normal(ks[0], (N, L, E), dtype=jnp.float32)
    key_in = jax.random.normal(ks[1], (N, L, E), dtype=jnp.float32)
    query = jax.random.normal(ks[2], (N, L, E), dtype=jnp.float32)
    wv_t = jax.random.uniform(ks[3], (E, E), jnp.float32, -scale, scale)
    wk_t = jax.random.uniform(ks[4], (E, E), jnp.float32, -scale, scale)
    wq_t = jax.random.uniform(ks[5], (E, E), jnp.float32, -scale, scale)
    wo_t = jax.random.uniform(ks[6], (E, E), jnp.float32, -scale, scale)
    bo = jax.random.uniform(ks[7], (E,), jnp.float32, -scale, scale)

    out = topm_attention(value, key_in, query, wq_t, wk_t, wv_t, wo_t, bo,
                         heads=heads, m_value=m_value)
    out = jax.block_until_ready(out)

    ref = topm_attention_ref(value, key_in, query, wq_t, wk_t, wv_t, wo_t, bo,
                             heads=heads, m_value=m_value)
    assert out.shape == (N, L, E)
    assert jnp.allclose(out, ref, atol=1e-4, rtol=1e-4), \
        f"max abs err {jnp.max(jnp.abs(out - ref))}"
    print("KERNEL_OK")
</pallas_src>

<mosaic_0001>
module attributes {stable_mosaic.version = 11 : i64} {
  func.func @attn_kernel(%arg0: i32, %arg1: i32, %arg2: i32, %arg3: memref<1x8x32xf32, #tpu.memory_space<vmem>>, %arg4: memref<1x8x32xf32, #tpu.memory_space<vmem>>, %arg5: memref<1x8x32xf32, #tpu.memory_space<vmem>>, %arg6: memref<1x32x8xf32, #tpu.memory_space<vmem>>, %arg7: memref<1x32x8xf32, #tpu.memory_space<vmem>>, %arg8: memref<1x32x8xf32, #tpu.memory_space<vmem>>, %arg9: memref<1x1x8x8xf32, #tpu.memory_space<vmem>>, %arg10: memref<8x8xf32, #tpu.memory_space<vmem>>, %arg11: memref<8x8xf32, #tpu.memory_space<vmem>>) attributes {dimension_semantics = [#tpu.dimension_semantics<parallel>, #tpu.dimension_semantics<parallel>, #tpu.dimension_semantics<arbitrary>], iteration_bounds = array<i64: 2, 4, 1>, scalar_prefetch = 0 : i64, scratch_operands = 2 : i64, tpu.core_type = #tpu.core_type<tc>, window_params = [{transform_indices = @transform_0, window_bounds = array<i64: 1, 8, 32>}, {transform_indices = @transform_1, window_bounds = array<i64: 1, 8, 32>}, {transform_indices = @transform_2, window_bounds = array<i64: 1, 8, 32>}, {transform_indices = @transform_3, window_bounds = array<i64: 1, 32, 8>}, {transform_indices = @transform_4, window_bounds = array<i64: 1, 32, 8>}, {transform_indices = @transform_5, window_bounds = array<i64: 1, 32, 8>}, {transform_indices = @transform_6, window_bounds = array<i64: 1, 1, 8, 8>}]} {
    %c0_i32 = arith.constant 0 : i32
    %0 = arith.cmpi eq, %arg2, %c0_i32 : i32
    %1 = arith.extui %0 : i1 to i32
    %c0_i32_0 = arith.constant 0 : i32
    %2 = arith.cmpi ne, %1, %c0_i32_0 : i32
    scf.if %2 {
      %c0_31 = arith.constant 0 : index
      %c0_32 = arith.constant 0 : index
      %c0_33 = arith.constant 0 : index
      %66 = vector.load %arg4[%c0_31, %c0_32, %c0_33] : memref<1x8x32xf32, #tpu.memory_space<vmem>>, vector<1x8x32xf32>
      %67 = vector.shape_cast %66 : vector<1x8x32xf32> to vector<8x32xf32>
      %c0_34 = arith.constant 0 : index
      %c0_35 = arith.constant 0 : index
      %c0_36 = arith.constant 0 : index
      %68 = vector.load %arg7[%c0_34, %c0_35, %c0_36] : memref<1x32x8xf32, #tpu.memory_space<vmem>>, vector<1x32x8xf32>
      %69 = vector.shape_cast %68 : vector<1x32x8xf32> to vector<32x8xf32>
      %cst_37 = arith.constant dense<0.000000e+00> : vector<8x8xf32>
      %70 = tpu.matmul %67, %69, %cst_37 {dimension_numbers = #tpu.dot_dimension_numbers<[1], [0], [0], [1], [0, 0, 1, 1], [], []>} : vector<8x32xf32>, vector<32x8xf32>, vector<8x8xf32> -> vector<8x8xf32>
      %c0_38 = arith.constant 0 : index
      %c0_39 = arith.constant 0 : index
      %71 = vector.load %arg10[%c0_38, %c0_39] : memref<8x8xf32, #tpu.memory_space<vmem>>, vector<8x8xf32>
      tpu.vector_store %arg10[%c0_38, %c0_39], %70 {strides = array<i32>} : memref<8x8xf32, #tpu.memory_space<vmem>>, vector<8x8xf32>,
      %c0_40 = arith.constant 0 : index
      %c0_41 = arith.constant 0 : index
      %c0_42 = arith.constant 0 : index
      %72 = vector.load %arg5[%c0_40, %c0_41, %c0_42] : memref<1x8x32xf32, #tpu.memory_space<vmem>>, vector<1x8x32xf32>
      %73 = vector.shape_cast %72 : vector<1x8x32xf32> to vector<8x32xf32>
      %c0_43 = arith.constant 0 : index
      %c0_44 = arith.constant 0 : index
      %c0_45 = arith.constant 0 : index
      %74 = vector.load %arg8[%c0_43, %c0_44, %c0_45] : memref<1x32x8xf32, #tpu.memory_space<vmem>>, vector<1x32x8xf32>
      %75 = vector.shape_cast %74 : vector<1x32x8xf32> to vector<32x8xf32>
      %cst_46 = arith.constant dense<0.000000e+00> : vector<8x8xf32>
      %76 = tpu.matmul %73, %75, %cst_46 {dimension_numbers = #tpu.dot_dimension_numbers<[1], [0], [0], [1], [0, 0, 1, 1], [], []>} : vector<8x32xf32>, vector<32x8xf32>, vector<8x8xf32> -> vector<8x8xf32>
      %c0_47 = arith.constant 0 : index
      %c0_48 = arith.constant 0 : index
      %77 = vector.load %arg11[%c0_47, %c0_48] : memref<8x8xf32, #tpu.memory_space<vmem>>, vector<8x8xf32>
      tpu.vector_store %arg11[%c0_47, %c0_48], %76 {strides = array<i32>} : memref<8x8xf32, #tpu.memory_space<vmem>>, vector<8x8xf32>,
    } else {
    }
    %c0 = arith.constant 0 : index
    %c0_1 = arith.constant 0 : index
    %c0_2 = arith.constant 0 : index
    %3 = vector.load %arg3[%c0, %c0_1, %c0_2] : memref<1x8x32xf32, #tpu.memory_space<vmem>>, vector<1x8x32xf32>
    %4 = vector.shape_cast %3 : vector<1x8x32xf32> to vector<8x32xf32>
    %c0_3 = arith.constant 0 : index
    %c0_4 = arith.constant 0 : index
    %c0_5 = arith.constant 0 : index
    %5 = vector.load %arg6[%c0_3, %c0_4, %c0_5] : memref<1x32x8xf32, #tpu.memory_space<vmem>>, vector<1x32x8xf32>
    %6 = vector.shape_cast %5 : vector<1x32x8xf32> to vector<32x8xf32>
    %cst = arith.constant dense<0.000000e+00> : vector<8x8xf32>
    %7 = tpu.matmul %4, %6, %cst {dimension_numbers = #tpu.dot_dimension_numbers<[1], [0], [0], [1], [0, 0, 1, 1], [], []>} : vector<8x32xf32>, vector<32x8xf32>, vector<8x8xf32> -> vector<8x8xf32>
    %c0_6 = arith.constant 0 : index
    %c0_7 = arith.constant 0 : index
    %8 = vector.load %arg10[%c0_6, %c0_7] : memref<8x8xf32, #tpu.memory_space<vmem>>, vector<8x8xf32>
    %cst_8 = arith.constant dense<0.000000e+00> : vector<8x8xf32>
    %9 = tpu.matmul %7, %8, %cst_8 {dimension_numbers = #tpu.dot_dimension_numbers<[1], [1], [0], [0], [0, 0, 1, 0], [], []>} : vector<8x8xf32>, vector<8x8xf32>, vector<8x8xf32> -> vector<8x8xf32>
    %10 = tpu.iota {dimensions = array<i32: 1>} : vector<8x8xi32>
    %cst_9 = arith.constant dense<0xFF800000> : vector<8xf32>
    %11 = vector.multi_reduction <maximumf>, %9, %cst_9 [1] : vector<8x8xf32> to vector<8xf32>
    %12 = vector.shape_cast %11 : vector<8xf32> to vector<8x1xf32>
    %cst_10 = arith.constant 0.000000e+00 : f32
    %13 = vector.broadcast %cst_10 : f32 to vector<8x8xf32>
    %14 = vector.broadcast %12 : vector<8x1xf32> to vector<8x8xf32>
    %15 = arith.cmpf oeq, %9, %14 : vector<8x8xf32>
    %c8_i32 = arith.constant 8 : i32
    %16 = vector.broadcast %c8_i32 : i32 to vector<8x8xi32>
    %17 = arith.select %15, %10, %16 : vector<8x8xi1>, vector<8x8xi32>
    %cst_11 = arith.constant dense<2147483647> : vector<8xi32>
    %18 = vector.multi_reduction <minsi>, %17, %cst_11 [1] : vector<8x8xi32> to vector<8xi32>
    %19 = vector.shape_cast %18 : vector<8xi32> to vector<8x1xi32>
    %20 = vector.broadcast %19 : vector<8x1xi32> to vector<8x8xi32>
    %21 = arith.cmpi eq, %10, %20 : vector<8x8xi32>
    %cst_12 = arith.constant 1.000000e+00 : f32
    %22 = vector.broadcast %cst_12 : f32 to vector<8x8xf32>
    %23 = arith.select %21, %22, %13 : vector<8x8xi1>, vector<8x8xf32>
    %cst_13 = arith.constant 0xFF800000 : f32
    %24 = vector.broadcast %cst_13 : f32 to vector<8x8xf32>
    %25 = arith.select %21, %24, %9 : vector<8x8xi1>, vector<8x8xf32>
    %cst_14 = arith.constant dense<0xFF800000> : vector<8xf32>
    %26 = vector.multi_reduction <maximumf>, %25, %cst_14 [1] : vector<8x8xf32> to vector<8xf32>
    %27 = vector.shape_cast %26 : vector<8xf32> to vector<8x1xf32>
    %28 = vector.broadcast %27 : vector<8x1xf32> to vector<8x8xf32>
    %29 = arith.cmpf oeq, %25, %28 : vector<8x8xf32>
    %c8_i32_15 = arith.constant 8 : i32
    %30 = vector.broadcast %c8_i32_15 : i32 to vector<8x8xi32>
    %31 = arith.select %29, %10, %30 : vector<8x8xi1>, vector<8x8xi32>
    %cst_16 = arith.constant dense<2147483647> : vector<8xi32>
    %32 = vector.multi_reduction <minsi>, %31, %cst_16 [1] : vector<8x8xi32> to vector<8xi32>
    %33 = vector.shape_cast %32 : vector<8xi32> to vector<8x1xi32>
    %34 = vector.broadcast %33 : vector<8x1xi32> to vector<8x8xi32>
    %35 = arith.cmpi eq, %10, %34 : vector<8x8xi32>
    %cst_17 = arith.constant 1.000000e+00 : f32
    %36 = vector.broadcast %cst_17 : f32 to vector<8x8xf32>
    %37 = arith.select %35, %36, %23 : vector<8x8xi1>, vector<8x8xf32>
    %cst_18 = arith.constant 0xFF800000 : f32
    %38 = vector.broadcast %cst_18 : f32 to vector<8x8xf32>
    %39 = arith.select %35, %38, %25 : vector<8x8xi1>, vector<8x8xf32>
    %cst_19 = arith.constant dense<0xFF800000> : vector<8xf32>
    %40 = vector.multi_reduction <maximumf>, %39, %cst_19 [1] : vector<8x8xf32> to vector<8xf32>
    %41 = vector.shape_cast %40 : vector<8xf32> to vector<8x1xf32>
    %42 = vector.broadcast %41 : vector<8x1xf32> to vector<8x8xf32>
    %43 = arith.cmpf oeq, %39, %42 : vector<8x8xf32>
    %c8_i32_20 = arith.constant 8 : i32
    %44 = vector.broadcast %c8_i32_20 : i32 to vector<8x8xi32>
    %45 = arith.select %43, %10, %44 : vector<8x8xi1>, vector<8x8xi32>
    %cst_21 = arith.constant dense<2147483647> : vector<8xi32>
    %46 = vector.multi_reduction <minsi>, %45, %cst_21 [1] : vector<8x8xi32> to vector<8xi32>
    %47 = vector.shape_cast %46 : vector<8xi32> to vector<8x1xi32>
    %48 = vector.broadcast %47 : vector<8x1xi32> to vector<8x8xi32>
    %49 = arith.cmpi eq, %10, %48 : vector<8x8xi32>
    %cst_22 = arith.constant 1.000000e+00 : f32
    %50 = vector.broadcast %cst_22 : f32 to vector<8x8xf32>
    %51 = arith.select %49, %50, %37 : vector<8x8xi1>, vector<8x8xf32>
    %52 = vector.broadcast %12 : vector<8x1xf32> to vector<8x8xf32>
    %53 = arith.subf %9, %52 : vector<8x8xf32>
    %54 = math.exp %53 : vector<8x8xf32>
    %55 = arith.mulf %54, %51 : vector<8x8xf32>
    %cst_23 = arith.constant dense<0.000000e+00> : vector<8xf32>
    %56 = vector.multi_reduction <add>, %55, %cst_23 [1] : vector<8x8xf32> to vector<8xf32>
    %57 = vector.shape_cast %56 : vector<8xf32> to vector<8x1xf32>
    %58 = tpu.reciprocal %57 : vector<8x1xf32> -> vector<8x1xf32>
    %59 = vector.broadcast %58 : vector<8x1xf32> to vector<8x8xf32>
    %60 = arith.mulf %55, %59 : vector<8x8xf32>
    %c0_24 = arith.constant 0 : index
    %c0_25 = arith.constant 0 : index
    %61 = vector.load %arg11[%c0_24, %c0_25] : memref<8x8xf32, #tpu.memory_space<vmem>>, vector<8x8xf32>
    %cst_26 = arith.constant dense<0.000000e+00> : vector<8x8xf32>
    %62 = tpu.matmul %60, %61, %cst_26 {dimension_numbers = #tpu.dot_dimension_numbers<[1], [0], [0], [1], [0, 0, 1, 1], [], []>} : vector<8x8xf32>, vector<8x8xf32>, vector<8x8xf32> -> vector<8x8xf32>
    %c0_27 = arith.constant 0 : index
    %c0_28 = arith.constant 0 : index
    %c0_29 = arith.constant 0 : index
    %c0_30 = arith.constant 0 : index
    %63 = vector.load %arg9[%c0_27, %c0_28, %c0_29, %c0_30] : memref<1x1x8x8xf32, #tpu.memory_space<vmem>>, vector<1x1x8x8xf32>
    %64 = vector.shape_cast %63 : vector<1x1x8x8xf32> to vector<8x8xf32>
    %65 = vector.shape_cast %62 : vector<8x8xf32> to vector<1x1x8x8xf32>
    tpu.vector_store %arg9[%c0_27, %c0_28, %c0_29, %c0_30], %65 {strides = array<i32>} : memref<1x1x8x8xf32, #tpu.memory_space<vmem>>, vector<1x1x8x8xf32>,
    return
  }
  func.func @transform_0(%arg0: i32, %arg1: i32, %arg2: i32) -> (i32, i32, i32) {
    %c0_i32 = arith.constant 0 : i32
    %c0_i32_0 = arith.constant 0 : i32
    return %arg0, %arg2, %c0_i32 : i32, i32, i32
  }
  func.func @transform_1(%arg0: i32, %arg1: i32, %arg2: i32) -> (i32, i32, i32) {
    %c0_i32 = arith.constant 0 : i32
    %c0_i32_0 = arith.constant 0 : i32
    %c0_i32_1 = arith.constant 0 : i32
    return %arg0, %c0_i32, %c0_i32_0 : i32, i32, i32
  }
  func.func @transform_2(%arg0: i32, %arg1: i32, %arg2: i32) -> (i32, i32, i32) {
    %c0_i32 = arith.constant 0 : i32
    %c0_i32_0 = arith.constant 0 : i32
    %c0_i32_1 = arith.constant 0 : i32
    return %arg0, %c0_i32, %c0_i32_0 : i32, i32, i32
  }
  func.func @transform_3(%arg0: i32, %arg1: i32, %arg2: i32) -> (i32, i32, i32) {
    %c0_i32 = arith.constant 0 : i32
    %c0_i32_0 = arith.constant 0 : i32
    %c0_i32_1 = arith.constant 0 : i32
    return %arg1, %c0_i32, %c0_i32_0 : i32, i32, i32
  }
  func.func @transform_4(%arg0: i32, %arg1: i32, %arg2: i32) -> (i32, i32, i32) {
    %c0_i32 = arith.constant 0 : i32
    %c0_i32_0 = arith.constant 0 : i32
    %c0_i32_1 = arith.constant 0 : i32
    return %arg1, %c0_i32, %c0_i32_0 : i32, i32, i32
  }
  func.func @transform_5(%arg0: i32, %arg1: i32, %arg2: i32) -> (i32, i32, i32) {
    %c0_i32 = arith.constant 0 : i32
    %c0_i32_0 = arith.constant 0 : i32
    %c0_i32_1 = arith.constant 0 : i32
    return %arg1, %c0_i32, %c0_i32_0 : i32, i32, i32
  }
  func.func @transform_6(%arg0: i32, %arg1: i32, %arg2: i32) -> (i32, i32, i32, i32) {
    %c0_i32 = arith.constant 0 : i32
    %c0_i32_0 = arith.constant 0 : i32
    return %arg0, %arg1, %arg2, %c0_i32 : i32, i32, i32, i32
  }
}

</mosaic_0001>

<bundles_post_ra>
// kernel: tpu_custom_call.1
= control target key start
LH: loop header
LB: loop body
LE: loop exit
PB: predicated region body
PF: predicated region fallthrough
CT: control target
= control target key end

     0   :  { %s1193_s0 = inlined_call_operand.vmem [shape: f32[2,8,32], index: 0, kind: input, shape index: {}]   ;;  %s1194_s1 = inlined_call_operand.vmem [shape: f32[2,8,32], index: 1, kind: input, shape index: {}]   ;;  %s1195_s2 = inlined_call_operand.vmem [shape: f32[2,8,32], index: 2, kind: input, shape index: {}]   ;;  %s1196_s3 = inlined_call_operand.vmem [shape: f32[4,32,8], index: 3, kind: input, shape index: {}]   ;;  %s1197_s4 = inlined_call_operand.vmem [shape: f32[4,32,8], index: 4, kind: input, shape index: {}]   ;;  %s1198_s5 = inlined_call_operand.vmem [shape: f32[4,32,8], index: 5, kind: input, shape index: {}]   ;;  %s1199_s6 = inlined_call_operand.hbm [shape: f32[2,4,8,8], index: 6, kind: output, shape index: {}]  }
   0x1   :  { %1200 = sst [smem:[#allocation7_spill]] %s1193_s0 }
   0x2   :  { %1201 = sst [smem:[#allocation8_spill]] %s1194_s1 }
   0x3   :  { %11 = vsyncpa [#allocation5], 0 }
   0x4   :  { %13 = vsyncpa [#allocation5 + $0x1], 0  ;;  %s1008_s21 = smov 0   ;;  %s1010_s22 = smov 0  }
   0x5   :  { %s1012_s23 = smov 0   ;;  %s1014_s24 = smov 0  }
   0x6   :  { %s1016_s25 = smov 0   ;;  %s1018_s26 = smov 0  }
   0x7   :  { %s1020_s27 = smov 0   ;;  %s1022_s28 = smov 0  }
   0x8 LB: > { %s771_s29 = sadd.s32 4294967295, %s970_s28   ;;  %s772_s30 = sadd.s32 4294967294, %s970_s28   ;;  %s970_s28 = sphi %s1022_s28, %s19_s28   ;;  %s966_s27 = sphi %s1020_s27, %s1212_s27   ;;  %s962_s26 = sphi %s1018_s26, %s1211_s26   ;;  %s958_s25 = sphi %s1016_s25, %s1210_s25   ;;  %s954_s24 = sphi %s1014_s24, %s1209_s24   ;;  %s950_s23 = sphi %s1012_s23, %s1208_s23   ;;  %s946_s22 = sphi %s1010_s22, %s1207_s22   ;;  %s942_s21 = sphi %s1008_s21, %s1206_s21  }
   0x9   : > { %s34_s7 = sadd.s32 1, %s962_s26  ;;  %s38_s8 = sadd.s32 1, %s966_s27 }
   0xa   : > { %p36_p0 = scmp.ge.s32.totalorder %s34_s7, 4  ;;  %p217_p1 = scmp.ne.s32.totalorder %s950_s23, %s946_s22 }
   0xb   : > { %p218_p2 = scmp.eq.s32.totalorder %s771_s29, 7  ;;  %p223_p5 = scmp.ne.s32.totalorder %s946_s22, %s942_s21 }
   0xc   : > { %s1214_s7 = smov (%p36_p0, %s34_s7), 0  ;;  %s1216_s8 = smov (!%p36_p0, %s38_s8), %s966_s27 }
   0xd   : > { %s201_s9 = ssub.s32 %s962_s26, %s1214_s7  ;;  %p1059_p3 = por %p218_p2, %p217_p1 }
   0xe   : > { %p40_p4 = scmp.ge.s32.totalorder %s1216_s8, 2  ;;  %p224_p6 = scmp.eq.s32.totalorder %s772_s30, 7 }
   0xf   : > { %p775_p7 = scmp.ge.s32.totalorder %s970_s28, 1  ;;  %p290_p9 = scmp.lt.s32.totalorder %s970_s28, 9 }
  0x10   : > { %s1218_s8 = smov (%p40_p4, %s1216_s8), 0  ;;  %p1068_p8 = por %p224_p6, %p223_p5 }
  0x11   : > { %s200_s12 = ssub.s32 %s966_s27, %s1218_s8  ;;  %s207_s13 = sadd.s32 1, %s950_s23 }
  0x12   : > { %s202_s14 = sor.u32 %s201_s9, %s200_s12  ;;  %p291_p10 = pnand %p775_p7, %p290_p9 }
  0x13   : > { %p205_p11 = scmp.eq.s32.totalorder %s202_s14, 0  ;;  %p360_p12 = scmp.lt.s32.totalorder (!%p291_p10), %s954_s24, 3 }
  0x14   : > { %294 = sbr.rel (%p291_p10) target bundleno = 1671 (0x687), region = 44  ;;  %p345_p13 = scmp.lt.s32.totalorder (!%p291_p10), %s958_s25, 1 }
  0x15   : > { %s1077_s15 = scalar_select %p205_p11, %s950_s23, %s207_s13  }
  0x16   : > { %s1204_s1 = sld [smem:[#allocation8_spill]] (!%p291_p10) }
  0x17   : > { %s1205_s0 = sld [smem:[#allocation7_spill]] (!%p291_p10) }
  0x19   : > { %s361_s16 = scalar_select %p360_p12, %s954_s24, 3  ;;  %vm384_vm0 = vcmask 261120   ;;  %vm408_vm1 = vcmask 64512   ;;  %v496_v15 = vlaneseq  ;;  %v972_v47 = vmov 0.0  }
  0x1a   : > { %s346_s17 = scalar_select %p345_p13, %s958_s25, 1 }
  0x1b   : > { %s1083_s18 = sshll.u32 %s361_s16, 5  ;;  %v1112_v16 = vand.u32 127, %v496_v15 }
  0x1c   : > { %s369_s29 = scalar_lea.vmem %s1197_s4, %s1083_s18  ;;  %s364_s12 = scalar_lea.vmem %s1196_s3, %s1083_s18 }
  0x1d   : > { %v383_v0 = vld [vmem:[%s369_s29 + $0x18] sm:$0xff]  ;;  %v382_v1 = vld [vmem:[%s369_s29 + $0x10] sm:$0xff]  ;;  %s1093_s13 = sshll.u32 %s346_s17, 3  ;;  %v381_v4 = vld [vmem:[%s369_s29 + $0x8] sm:$0xff] }
  0x1e   : > { %400 = vmatpush.msra.mxu0 %v383_v0  ;;  %v443_v2 = vld [vmem:[%s364_s12 + $0x18] sm:$0xff]  ;;  %v442_v3 = vld [vmem:[%s364_s12 + $0x10] sm:$0xff]  ;;  %s355_s19 = scalar_lea.vmem %s1204_s1, %s1093_s13  ;;  %v441_v5 = vld [vmem:[%s364_s12 + $0x8] sm:$0xff]  ;;  %s351_s9 = scalar_lea.vmem %s1205_s0, %s1093_s13 }
  0x1f   : > { %460 = vmatpush.msra.mxu2 %v443_v2  ;;  %v380_v6 = vld [vmem:[%s369_s29] sm:$0xff] }
  0x20   : > { %401 = vmatpush.msra.mxu0 %v382_v1  ;;  %v379_v7 = vld [vmem:[%s355_s19] sm:$0xff]  ;;  %s359_s19 = scalar_lea.vmem %s1195_s2, %s1093_s13  ;;  %s342_s13 = sand.u32 1, %s946_s22  }
  0x21   : > { %461 = vmatpush.msra.mxu2 %v442_v3  ;;  %v440_v8 = vld [vmem:[%s364_s12] sm:$0xff]  ;;  %s374_s12 = scalar_lea.vmem %s1198_s5, %s1083_s18  ;;  %s793_s18 = sshll.u32 %s958_s25, 2 }
  0x22   : > { %402 = vmatpush.msra.mxu0 %v381_v4  ;;  %v439_v9 = vld [vmem:[%s351_s9] sm:$0xff]  ;;  %v414_v57 = vld [vmem:[%s374_s12 + $0x18] sm:$0xff]  ;;  %v413_v58 = vld [vmem:[%s374_s12 + $0x10] sm:$0xff]  ;;  %s625_s20 = sadd.s32 %s954_s24, %s793_s18  ;;  %s776_s30 = sshll.u32 %s342_s13, 3 }
  0x23   : > { %462 = vmatpush.msra.mxu2 %v441_v5  ;;  %430 = vmatpush.msra.mxu1 %v414_v57  ;;  %v412_v59 = vld [vmem:[%s374_s12 + $0x8] sm:$0xff]  ;;  %v411_v0 = vld [vmem:[%s374_s12] sm:$0xff]  ;;  %s794_s9 = sshll.u32 %s625_s20, 3  ;;  %s344_s14 = scalar_lea.vmem [#allocation4], %s776_s30 }
  0x24   : > { %403 = vmatpush.msra.mxu0 %v380_v6  ;;  %v410_v1 = vld [vmem:[%s359_s19] sm:$0xff]  ;;  %s627_s12 = scalar_lea.hbm %s1199_s6, %s794_s9  ;;  %s629_s16 = sshll.u32 %s344_s14, 4  ;;  %s630_s16 = int_to_ptr.vmem [resolvable:$true] %s629_s16 }
  0x25   : > { %786 = vmatmul.msk.f32.vlgmr.msra.gmra.mxu0 %vm384_vm0, %v379_v7  ;;  %463 = vmatpush.msra.mxu2 %v440_v8  ;;  %s631_s19 = sshll.u32 %s627_s12, 4  ;;  %s614_s0 = scalar_lea.sflag [#allocation5], %s342_s13  ;;  %s632_s19 = int_to_ptr.hbm [resolvable:$true] %s631_s19 }
  0x26   : > { %788 = vmatmul.msk.f32.vlgmr.msra.gmra.mxu2 %vm384_vm0, %v439_v9  ;;  %431 = vmatpush.msra.mxu1 %v413_v58  ;;  %s890_s1 = sshra.s32 %s632_s19, 4  ;;  %s896_s20 = scalar_lea.hbm %s1199_s6, 64  ;;  %s891_s1 = int_to_ptr.hbm [resolvable:$true] %s890_s1 }
  0x27   : > { %s892_s25 = scalar_lea.hbm %s891_s1, 8  ;;  %p897_p4 = scmp.lt.s32.totalorder %s891_s1, %s1199_s6 }
  0x28   : > { %432 = vmatpush.msra.mxu1 %v412_v59  ;;  %p893_p0 = scmp.ne.s32.totalorder %s891_s1, %s892_s25  ;;  %p898_p5 = scmp.lt.s32.totalorder %s896_s20, %s892_s25 }
  0x2a   : > { %433 = vmatpush.msra.mxu1 %v411_v0  ;;  %p894_p1 = pnand %p893_p0, %p1059_p3  ;;  %p899_p6 = por %p898_p5, %p897_p4 }
  0x2b   : > { %787 = vmatmul.msk.f32.vlgmr.msra.gmra.mxu1 %vm384_vm0, %v410_v1 }
  0x2c   : > { %p895_p2 = pneg %p894_p1 }
  0x2e   : > { %p900_p7 = pnand %p899_p6, %p895_p2 }
  0xa2   : > { %v405_v10 = vpop.f32.mrf.mxu0 }
  0xa3   : > { %409 = vst.msk [vmem:[#allocation2] sm:$0xff] %vm408_vm1, %v405_v10 }
  0xa9   : > { %v465_v12 = vpop.f32.mrf.mxu2 }
  0xaa   : > { %v468_v11 = vld [vmem:[#allocation2] sm:$0xff] }
  0xab   : > { %789 = vmatpush.xpose.msk.msra.mxu3 %vm408_vm1, %v468_v11 }
  0xae   : > { %790 = vmatmul.msk.f32.vlgmr.msra.gmra.mxu3 %vm408_vm1, %v465_v12 }
 0x131   : > { %v1108_v13 = vpop.f32.mrf.mxu3 }
 0x132   : > { %v498_v14 = vsel %vm408_vm1, %v1108_v13, -inf }
 0x133   : > { %499 = vmax.xlane.f32.xlu0 %v498_v14  ;;  %v435_v14 = vpop.f32.mrf.mxu1 }
 0x134   : > { %438 = vst.msk [vmem:[#allocation3] sm:$0xff] %vm408_vm1, %v435_v14 }
 0x13b   : > { %v588_v15 = vld [vmem:[#allocation3] sm:$0xff] }
 0x13c   : > { %607 = vmatpush.msrb.mxu3 %v588_v15 }
 0x1a6   : > { %v1114_v17 = vpop.xlane.xlu0 %499 }
 0x1a7   : > { %vm501_vm2 = vcmp.eq.f32.partialorder %v1108_v13, %v1114_v17  ;;  %v566_v2 = vsub.f32 %v1108_v13, %v1114_v17 }
 0x1a8   : > { %v502_v18 = vsel %vm501_vm2, %v1112_v16, 8 }
 0x1a9   : > { %v503_v19 = vsel %vm408_vm1, %v502_v18, 2147483647  ;;  %v567_v3 = vmul.f32 1.442695, %v566_v2 }
 0x1aa   : > { %v505_v20 = vshra.s32 %v503_v19, 16  ;;  %v504_v22 = vand.u32 65535, %v503_v19 }
 0x1ab   : > { %872 = vpow2.f32 %v567_v3 }
 0x1ac   : > { %v507_v21 = vcvt.s32.f32 %v505_v20  ;;  %v506_v24 = vcvt.s32.f32 %v504_v22 }
 0x1ae   : > { %508 = vmin.xlane.f32.xlu0 %v507_v21 }
 0x1b1   : > { %v873_v9 = vpop.eup %872 }
 0x221   : > { %v509_v23 = vpop.xlane.xlu0 %508 }
 0x222   : > { %vm510_vm3 = vcmp.eq.f32.partialorder %v507_v21, %v509_v23  ;;  %v515_v26 = vcvt.f32.s32 %v509_v23 }
 0x223   : > { %v511_v25 = vsel %vm510_vm3, %v506_v24, inf }
 0x224   : > { %512 = vmin.xlane.f32.xlu1 %v511_v25  ;;  %v516_v28 = vshll.u32 %v515_v26, 16 }
 0x297   : > { %v513_v27 = vpop.xlane.xlu1 %512 }
 0x298   : > { %v514_v29 = vcvt.f32.s32 %v513_v27 }
 0x29a   : > { %v517_v30 = vadd.s32 %v516_v28, %v514_v29 }
 0x29c   : > { %vm518_vm4 = vcmp.eq.s32.totalorder %v1112_v16, %v517_v30 }
 0x29d   : > { %v520_v31 = vsel %vm518_vm4, -inf, %v1108_v13  ;;  %v519_v48 = vsel %vm518_vm4, 1.0, %v972_v47 }
 0x29e   : > { %v521_v32 = vsel %vm408_vm1, %v520_v31, -inf }
 0x29f   : > { %522 = vmax.xlane.f32.xlu1 %v521_v32 }
 0x312   : > { %v523_v33 = vpop.xlane.xlu1 %522 }
 0x313   : > { %vm524_vm5 = vcmp.eq.f32.partialorder %v520_v31, %v523_v33 }
 0x314   : > { %v525_v34 = vsel %vm524_vm5, %v1112_v16, 8 }
 0x315   : > { %v526_v35 = vsel %vm408_vm1, %v525_v34, 2147483647 }
 0x316   : > { %v528_v36 = vshra.s32 %v526_v35, 16  ;;  %v527_v38 = vand.u32 65535, %v526_v35 }
 0x318   : > { %v530_v37 = vcvt.s32.f32 %v528_v36  ;;  %v529_v40 = vcvt.s32.f32 %v527_v38 }
 0x31a   : > { %531 = vmin.xlane.f32.xlu2 %v530_v37 }
 0x38d   : > { %v532_v39 = vpop.xlane.xlu2 %531 }
 0x38e   : > { %vm533_vm6 = vcmp.eq.f32.partialorder %v530_v37, %v532_v39  ;;  %v538_v42 = vcvt.f32.s32 %v532_v39 }
 0x38f   : > { %v534_v41 = vsel %vm533_vm6, %v529_v40, inf }
 0x390   : > { %535 = vmin.xlane.f32.xlu2 %v534_v41  ;;  %v539_v44 = vshll.u32 %v538_v42, 16 }
 0x403   : > { %v536_v43 = vpop.xlane.xlu2 %535 }
 0x404   : > { %v537_v45 = vcvt.f32.s32 %v536_v43 }
 0x406   : > { %v540_v46 = vadd.s32 %v539_v44, %v537_v45 }
 0x408   : > { %vm541_vm7 = vcmp.eq.s32.totalorder %v1112_v16, %v540_v46 }
 0x409   : > { %v543_v49 = vsel %vm541_vm7, -inf, %v520_v31  ;;  %v542_v50 = vsel %vm541_vm7, 1.0, %v519_v48 }
 0x40a   : > { %v544_v51 = vsel %vm408_vm1, %v543_v49, -inf }
 0x40b   : > { %545 = vmax.xlane.f32.xlu0 %v544_v51 }
 0x47e   : > { %v546_v52 = vpop.xlane.xlu0 %545 }
 0x47f   : > { %vm547_vm8 = vcmp.eq.f32.partialorder %v543_v49, %v546_v52 }
 0x480   : > { %v548_v53 = vsel %vm547_vm8, %v1112_v16, 8 }
 0x481   : > { %v549_v54 = vsel %vm408_vm1, %v548_v53, 2147483647 }
 0x482   : > { %v551_v55 = vshra.s32 %v549_v54, 16  ;;  %v550_v60 = vand.u32 65535, %v549_v54 }
 0x484   : > { %v553_v56 = vcvt.s32.f32 %v551_v55  ;;  %v552_v62 = vcvt.s32.f32 %v550_v60 }
 0x486   : > { %554 = vmin.xlane.f32.xlu1 %v553_v56 }
 0x4f9   : > { %v555_v61 = vpop.xlane.xlu1 %554 }
 0x4fa   : > { %vm556_vm9 = vcmp.eq.f32.partialorder %v553_v56, %v555_v61  ;;  %v561_v4 = vcvt.f32.s32 %v555_v61 }
 0x4fb   : > { %v557_v63 = vsel %vm556_vm9, %v552_v62, inf }
 0x4fc   : > { %558 = vmin.xlane.f32.xlu2 %v557_v63  ;;  %v562_v6 = vshll.u32 %v561_v4, 16 }
 0x56f   : > { %v559_v5 = vpop.xlane.xlu2 %558 }
 0x570   : > { %v560_v7 = vcvt.f32.s32 %v559_v5 }
 0x572   : > { %v563_v8 = vadd.s32 %v562_v6, %v560_v7 }
 0x574   : > { %vm564_vm10 = vcmp.eq.s32.totalorder %v1112_v16, %v563_v8 }
 0x575   : > { %v565_v10 = vsel %vm564_vm10, 1.0, %v542_v50 }
 0x576   : > { %v569_v11 = vmul.f32 %v873_v9, %v565_v10 }
 0x578   : > { %v570_v12 = vsel %vm408_vm1, %v569_v11, 0.0 }
 0x579   : > { %571 = vadd.xlane.f32.xlu0 %v570_v12 }
 0x5ec   : > { %v572_v13 = vpop.xlane.xlu0 %571 }
 0x5ed   : > { %874 = vrcp.f32 %v572_v13  ;;  %v584_v16 = vand.u32 2147483648, %v572_v13  ;;  %v582_v21 = vand.u32 2147483647, %v572_v13  ;;  %vm578_vm12 = vweird.f32 %v572_v13 }
 0x5ef   : > { %v585_v23 = vor.u32 1.1754944e-38, %v584_v16  ;;  %vm583_vm14 = vcmp.eq.f32.partialorder %v582_v21, 8.507059e+37 }
 0x5f3   : > { %v875_v17 = vpop.eup %874 }
 0x5f4   : > { %v574_v18 = vmul.f32 %v875_v17, %v572_v13  ;;  %vm579_vm11 = vweird.f32 %v875_v17 }
 0x5f5   : > { %vm580_vm13 = vmor %vm578_vm12, %vm579_vm11 }
 0x5f6   : > { %v575_v19 = vsub.f32 1.0, %v574_v18 }
 0x5f8   : > { %v576_v20 = vmul.f32 %v875_v17, %v575_v19 }
 0x5fa   : > { %v577_v22 = vadd.f32 %v875_v17, %v576_v20 }
 0x5fc   : > { %v581_v24 = vsel %vm580_vm13, %v875_v17, %v577_v22 }
 0x5fd   : > { %v586_v25 = vsel %vm583_vm14, %v585_v23, %v581_v24 }
 0x5fe   : > { %v587_v26 = vmul.f32 %v586_v25, %v569_v11 }
 0x600   : > { %791 = vmatmul.msk.f32.vlgmr.msrb.gmra.mxu3 %vm408_vm1, %v587_v26 }
 0x683   : > { %v609_v27 = vpop.f32.mrf.mxu3 }
 0x684   : > { %612 = vst.msk [vmem:[%s344_s14] sm:$0xff] %vm408_vm1, %v609_v27 }
 0x685   : > { %903 = shalt.err (!%p900_p7)
}
 0x686   : > { %800 = dma.vmem_to_hbm [thread:$0]  (%p1059_p3), %s630_s16, 128, %s632_s19, %s614_s0  }
 0x687 PF: > { %p806_p9 = scmp.ge.s32.totalorder %s970_s28, 2  ;;  %s643_s13 = sand.u32 1, %s942_s21  }
 0x688   : > { %s644_s17 = scalar_lea.sflag [#allocation5], %s643_s13 }
 0x689   : > { %p803_p10 = pnand %p806_p9, %p1068_p8 }
 0x68b   : > { %p804_p11 = pneg %p803_p10 }
 0x68d   : > { %937 = dma.done.wait (%p804_p11), %s644_s17, 128  }
 0x68e   : > { %939 = vsyncadd (%p804_p11), %s644_s17, 4294967168  ;;  %s19_s28 = sadd.s32 1, %s970_s28   ;;  %s1206_s21 = smov %s946_s22 }
 0x68f   : > { %p16_p12 = scmp.ge.s32.totalorder %s19_s28, 10   ;;  %s1207_s22 = smov %s950_s23 }
 0x690   : > { %s1208_s23 = smov %s1077_s15  ;;  %s1209_s24 = smov %s962_s26 }
 0x691   : > { %s1210_s25 = smov %s966_s27  ;;  %s1211_s26 = smov %s1214_s7 }
 0x692   : > { %s1212_s27 = smov %s1218_s8  ;;  %18 = sbr.rel (!%p16_p12) target bundleno = 8 (0x8), region = 98 }
 0x697   :  { %650 = vsyncpa [#allocation5], 1 }
 0x698   :  { %652 = vsyncpa [#allocation5 + $0x1], 1 }

</bundles_post_ra>
